<compile_context>
chip_gen: v5e
topology: v5e:2x2
jax: 0.10.0
libtpu: 0.0.40
codegen_flags: <defaults>
</compile_context>

<pallas_src>
import jax
import jax.numpy as jnp
from jax.experimental import pallas as pl
from jax.experimental.pallas import tpu as pltpu


def reward_mlp_kernel(h_ref, s_ref, w1a_ref, w1b_ref, b1_ref, w2_ref, b2_ref,
                      w3_ref, b3_ref, o_ref):
    # fc1 + relu, concat fused: cat(h, s) @ w1 == h @ w1a + s @ w1b.
    h1 = jnp.dot(h_ref[...], w1a_ref[...], preferred_element_type=jnp.float32)
    h1 = h1 + jnp.dot(s_ref[...], w1b_ref[...],
                      preferred_element_type=jnp.float32)
    h1 = jnp.maximum(h1 + b1_ref[...], 0.0)
    # fc2 + relu
    h2 = jnp.dot(h1, w2_ref[...], preferred_element_type=jnp.float32)
    h2 = jnp.maximum(h2 + b2_ref[...], 0.0)
    # fc3 (no activation); single VPU add + store epilogue (o_ref is f32).
    o_ref[...] = jnp.dot(h2, w3_ref[...],
                         preferred_element_type=jnp.float32) + b3_ref[...]


def _round_up(x, m):
    return ((x + m - 1) // m) * m


def _choose_batch_tile(batch, block_rows, min_grid_steps):
    """Pick the batch tile.

    - batch <= 8: single full-batch tile (block dim equals array dim, so the
      (8, 128) constraint is satisfied even for tiny batches).
    - batch > 8: tile divisible by 8, capped by block_rows, and small enough
      to give at least `min_grid_steps` grid steps so v7x's two TensorCores
      both get work under dimension_semantics=("parallel",).
    """
    if batch <= 8:
        return batch
    tm = _round_up(pl.cdiv(batch, min_grid_steps), 8)
    tm = min(tm, block_rows, _round_up(batch, 8))
    return max(tm, 8)


def reward_model_forward(h, s, params, *, block_rows=4096, min_grid_steps=2):
    """h: (B, hidden_dim), s: (B, state_dim). Returns (B, 2) float32."""
    w1, b1, w2, b2, w3, b3 = params
    B, hidden_dim = h.shape
    state_dim = s.shape[1]
    out_dim = w3.shape[1]

    # Split the fused-concat weight once here (never slice the Ref in-kernel).
    w1a = w1[:hidden_dim, :]
    w1b = w1[hidden_dim:, :]

    tm = _choose_batch_tile(B, block_rows, min_grid_steps)
    grid = (pl.cdiv(B, tm),)

    # h/s/out tiles walk the batch axis; weights/biases use a constant
    # index_map so they are DMA'd once and stay resident in VMEM.
    # (If an xprof trace on v5e shows exposed input DMA at large tm, add
    #  pipeline_mode=pl.Buffered(3) to the h/s row specs.)
    def row_spec(ncols):
        return pl.BlockSpec((tm, ncols), lambda i: (i, 0))

    def const_spec(shape):
        return pl.BlockSpec(shape, lambda i: (0, 0))

    return pl.pallas_call(
        reward_mlp_kernel,
        out_shape=jax.ShapeDtypeStruct((B, out_dim), jnp.float32),
        grid=grid,
        in_specs=[
            row_spec(hidden_dim),                  # h tile
            row_spec(state_dim),                   # s tile
            const_spec(w1a.shape), const_spec(w1b.shape), const_spec(b1.shape),
            const_spec(w2.shape), const_spec(b2.shape),
            const_spec(w3.shape), const_spec(b3.shape),
        ],
        out_specs=row_spec(out_dim),
        compiler_params=pltpu.CompilerParams(
            dimension_semantics=("parallel",)),    # shards batch across TCs (v7x)
    )(h, s, w1a, w1b, b1, w2, b2, w3, b3)


def init_params(key, hidden_dim, state_dim):
    """Deterministic synthetic init matching nn.Linear shapes (transposed).

    Biases kept 2D (1, out) for TPU layout."""
    k1, k2, k3, k4, k5, k6 = jax.random.split(key, 6)
    in1 = hidden_dim + state_dim

    def unif(k, shape, fan_in):
        bound = 1.0 / jnp.sqrt(fan_in)
        return jax.random.uniform(k, shape, jnp.float32, -bound, bound)

    w1 = unif(k1, (in1, hidden_dim), in1)
    b1 = unif(k2, (1, hidden_dim), in1)
    w2 = unif(k3, (hidden_dim, hidden_dim), hidden_dim)
    b2 = unif(k4, (1, hidden_dim), hidden_dim)
    w3 = unif(k5, (hidden_dim, 2), hidden_dim)
    b3 = unif(k6, (1, 2), hidden_dim)
    return (w1, b1, w2, b2, w3, b3)


def reference_forward(h, s, params):
    """Pure-JAX reference matching the PyTorch module semantics."""
    w1, b1, w2, b2, w3, b3 = params
    x = jnp.concatenate([h, s], axis=-1)
    x = jnp.maximum(x @ w1 + b1, 0.0)
    x = jnp.maximum(x @ w2 + b2, 0.0)
    return x @ w3 + b3


if __name__ == "__main__":
    hidden_dim = 32
    state_dim = 16
    batch = 8

    key = jax.random.PRNGKey(0)
    kp, kh, ks = jax.random.split(key, 3)

    params = init_params(kp, hidden_dim, state_dim)
    h = jax.random.normal(kh, (batch, hidden_dim), jnp.float32)
    s = jax.random.normal(ks, (batch, state_dim), jnp.float32)

    out = reward_model_forward(h, s, params)
    out = jax.block_until_ready(out)

    ref = reference_forward(h, s, params)
    assert out.shape == (batch, 2), out.shape
    assert jnp.allclose(out, ref, atol=1e-4, rtol=1e-4), (
        f"mismatch: max abs err {jnp.max(jnp.abs(out - ref))}")

    print("KERNEL_OK")
</pallas_src>

<mosaic_0001>
module attributes {stable_mosaic.version = 11 : i64} {
  func.func @reward_mlp_kernel(%arg0: i32, %arg1: memref<8x32xf32, #tpu.memory_space<vmem>>, %arg2: memref<8x16xf32, #tpu.memory_space<vmem>>, %arg3: memref<32x32xf32, #tpu.memory_space<vmem>>, %arg4: memref<16x32xf32, #tpu.memory_space<vmem>>, %arg5: memref<1x32xf32, #tpu.memory_space<vmem>>, %arg6: memref<32x32xf32, #tpu.memory_space<vmem>>, %arg7: memref<1x32xf32, #tpu.memory_space<vmem>>, %arg8: memref<32x2xf32, #tpu.memory_space<vmem>>, %arg9: memref<1x2xf32, #tpu.memory_space<vmem>>, %arg10: memref<8x2xf32, #tpu.memory_space<vmem>>) attributes {dimension_semantics = [#tpu.dimension_semantics<parallel>], iteration_bounds = array<i64: 1>, scalar_prefetch = 0 : i64, scratch_operands = 0 : i64, tpu.core_type = #tpu.core_type<tc>, window_params = [{transform_indices = @transform_0, window_bounds = array<i64: 8, 32>}, {transform_indices = @transform_1, window_bounds = array<i64: 8, 16>}, {pipeline_mode = #tpu.pipeline_mode<synchronous>, transform_indices = @transform_2, window_bounds = array<i64: 32, 32>}, {pipeline_mode = #tpu.pipeline_mode<synchronous>, transform_indices = @transform_3, window_bounds = array<i64: 16, 32>}, {pipeline_mode = #tpu.pipeline_mode<synchronous>, transform_indices = @transform_4, window_bounds = array<i64: 1, 32>}, {pipeline_mode = #tpu.pipeline_mode<synchronous>, transform_indices = @transform_5, window_bounds = array<i64: 32, 32>}, {pipeline_mode = #tpu.pipeline_mode<synchronous>, transform_indices = @transform_6, window_bounds = array<i64: 1, 32>}, {pipeline_mode = #tpu.pipeline_mode<synchronous>, transform_indices = @transform_7, window_bounds = array<i64: 32, 2>}, {pipeline_mode = #tpu.pipeline_mode<synchronous>, transform_indices = @transform_8, window_bounds = array<i64: 1, 2>}, {transform_indices = @transform_9, window_bounds = array<i64: 8, 2>}]} {
    %c0 = arith.constant 0 : index
    %c0_0 = arith.constant 0 : index
    %0 = vector.load %arg1[%c0, %c0_0] : memref<8x32xf32, #tpu.memory_space<vmem>>, vector<8x32xf32>
    %c0_1 = arith.constant 0 : index
    %c0_2 = arith.constant 0 : index
    %1 = vector.load %arg3[%c0_1, %c0_2] : memref<32x32xf32, #tpu.memory_space<vmem>>, vector<32x32xf32>
    %cst = arith.constant dense<0.000000e+00> : vector<8x32xf32>
    %2 = tpu.matmul %0, %1, %cst {dimension_numbers = #tpu.dot_dimension_numbers<[1], [0], [0], [1], [0, 0, 1, 1], [], []>} : vector<8x32xf32>, vector<32x32xf32>, vector<8x32xf32> -> vector<8x32xf32>
    %c0_3 = arith.constant 0 : index
    %c0_4 = arith.constant 0 : index
    %3 = vector.load %arg2[%c0_3, %c0_4] : memref<8x16xf32, #tpu.memory_space<vmem>>, vector<8x16xf32>
    %c0_5 = arith.constant 0 : index
    %c0_6 = arith.constant 0 : index
    %4 = vector.load %arg4[%c0_5, %c0_6] : memref<16x32xf32, #tpu.memory_space<vmem>>, vector<16x32xf32>
    %cst_7 = arith.constant dense<0.000000e+00> : vector<8x32xf32>
    %5 = tpu.matmul %3, %4, %cst_7 {dimension_numbers = #tpu.dot_dimension_numbers<[1], [0], [0], [1], [0, 0, 1, 1], [], []>} : vector<8x16xf32>, vector<16x32xf32>, vector<8x32xf32> -> vector<8x32xf32>
    %6 = arith.addf %2, %5 : vector<8x32xf32>
    %c0_8 = arith.constant 0 : index
    %c0_9 = arith.constant 0 : index
    %7 = vector.load %arg5[%c0_8, %c0_9] : memref<1x32xf32, #tpu.memory_space<vmem>>, vector<1x32xf32>
    %8 = vector.broadcast %7 : vector<1x32xf32> to vector<8x32xf32>
    %9 = arith.addf %6, %8 : vector<8x32xf32>
    %cst_10 = arith.constant 0.000000e+00 : f32
    %10 = vector.broadcast %cst_10 : f32 to vector<8x32xf32>
    %11 = arith.maximumf %9, %10 : vector<8x32xf32>
    %c0_11 = arith.constant 0 : index
    %c0_12 = arith.constant 0 : index
    %12 = vector.load %arg6[%c0_11, %c0_12] : memref<32x32xf32, #tpu.memory_space<vmem>>, vector<32x32xf32>
    %cst_13 = arith.constant dense<0.000000e+00> : vector<8x32xf32>
    %13 = tpu.matmul %11, %12, %cst_13 {dimension_numbers = #tpu.dot_dimension_numbers<[1], [0], [0], [1], [0, 0, 1, 1], [], []>} : vector<8x32xf32>, vector<32x32xf32>, vector<8x32xf32> -> vector<8x32xf32>
    %c0_14 = arith.constant 0 : index
    %c0_15 = arith.constant 0 : index
    %14 = vector.load %arg7[%c0_14, %c0_15] : memref<1x32xf32, #tpu.memory_space<vmem>>, vector<1x32xf32>
    %15 = vector.broadcast %14 : vector<1x32xf32> to vector<8x32xf32>
    %16 = arith.addf %13, %15 : vector<8x32xf32>
    %cst_16 = arith.constant 0.000000e+00 : f32
    %17 = vector.broadcast %cst_16 : f32 to vector<8x32xf32>
    %18 = arith.maximumf %16, %17 : vector<8x32xf32>
    %c0_17 = arith.constant 0 : index
    %c0_18 = arith.constant 0 : index
    %19 = vector.load %arg8[%c0_17, %c0_18] : memref<32x2xf32, #tpu.memory_space<vmem>>, vector<32x2xf32>
    %cst_19 = arith.constant dense<0.000000e+00> : vector<8x2xf32>
    %20 = tpu.matmul %18, %19, %cst_19 {dimension_numbers = #tpu.dot_dimension_numbers<[1], [0], [0], [1], [0, 0, 1, 1], [], []>} : vector<8x32xf32>, vector<32x2xf32>, vector<8x2xf32> -> vector<8x2xf32>
    %c0_20 = arith.constant 0 : index
    %c0_21 = arith.constant 0 : index
    %21 = vector.load %arg9[%c0_20, %c0_21] : memref<1x2xf32, #tpu.memory_space<vmem>>, vector<1x2xf32>
    %22 = vector.broadcast %21 : vector<1x2xf32> to vector<8x2xf32>
    %23 = arith.addf %20, %22 : vector<8x2xf32>
    %c0_22 = arith.constant 0 : index
    %c0_23 = arith.constant 0 : index
    %24 = vector.load %arg10[%c0_22, %c0_23] : memref<8x2xf32, #tpu.memory_space<vmem>>, vector<8x2xf32>
    tpu.vector_store %arg10[%c0_22, %c0_23], %23 {strides = array<i32>} : memref<8x2xf32, #tpu.memory_space<vmem>>, vector<8x2xf32>,
    return
  }
  func.func @transform_0(%arg0: i32) -> (i32, i32) {
    %c0_i32 = arith.constant 0 : i32
    %c0_i32_0 = arith.constant 0 : i32
    return %arg0, %c0_i32 : i32, i32
  }
  func.func @transform_1(%arg0: i32) -> (i32, i32) {
    %c0_i32 = arith.constant 0 : i32
    %c0_i32_0 = arith.constant 0 : i32
    return %arg0, %c0_i32 : i32, i32
  }
  func.func @transform_2(%arg0: i32) -> (i32, i32) {
    %c0_i32 = arith.constant 0 : i32
    %c0_i32_0 = arith.constant 0 : i32
    %c0_i32_1 = arith.constant 0 : i32
    return %c0_i32, %c0_i32_0 : i32, i32
  }
  func.func @transform_3(%arg0: i32) -> (i32, i32) {
    %c0_i32 = arith.constant 0 : i32
    %c0_i32_0 = arith.constant 0 : i32
    %c0_i32_1 = arith.constant 0 : i32
    return %c0_i32, %c0_i32_0 : i32, i32
  }
  func.func @transform_4(%arg0: i32) -> (i32, i32) {
    %c0_i32 = arith.constant 0 : i32
    %c0_i32_0 = arith.constant 0 : i32
    %c0_i32_1 = arith.constant 0 : i32
    return %c0_i32, %c0_i32_0 : i32, i32
  }
  func.func @transform_5(%arg0: i32) -> (i32, i32) {
    %c0_i32 = arith.constant 0 : i32
    %c0_i32_0 = arith.constant 0 : i32
    %c0_i32_1 = arith.constant 0 : i32
    return %c0_i32, %c0_i32_0 : i32, i32
  }
  func.func @transform_6(%arg0: i32) -> (i32, i32) {
    %c0_i32 = arith.constant 0 : i32
    %c0_i32_0 = arith.constant 0 : i32
    %c0_i32_1 = arith.constant 0 : i32
    return %c0_i32, %c0_i32_0 : i32, i32
  }
  func.func @transform_7(%arg0: i32) -> (i32, i32) {
    %c0_i32 = arith.constant 0 : i32
    %c0_i32_0 = arith.constant 0 : i32
    %c0_i32_1 = arith.constant 0 : i32
    return %c0_i32, %c0_i32_0 : i32, i32
  }
  func.func @transform_8(%arg0: i32) -> (i32, i32) {
    %c0_i32 = arith.constant 0 : i32
    %c0_i32_0 = arith.constant 0 : i32
    %c0_i32_1 = arith.constant 0 : i32
    return %c0_i32, %c0_i32_0 : i32, i32
  }
  func.func @transform_9(%arg0: i32) -> (i32, i32) {
    %c0_i32 = arith.constant 0 : i32
    %c0_i32_0 = arith.constant 0 : i32
    return %arg0, %c0_i32 : i32, i32
  }
}

</mosaic_0001>

<bundles_post_ra>
// kernel: tpu_custom_call.1
= control target key start
LH: loop header
LB: loop body
LE: loop exit
PB: predicated region body
PF: predicated region fallthrough
CT: control target
= control target key end

     0   :  { %14 = vsyncpa [#allocation3], 0  ;;  %s447_s0 = inlined_call_operand.hbm [shape: f32[8,32], index: 0, kind: input, shape index: {}]   ;;  %s448_s1 = inlined_call_operand.hbm [shape: f32[8,16], index: 1, kind: input, shape index: {}]   ;;  %s449_s2 = inlined_call_operand.vmem [shape: f32[32,32], index: 2, kind: input, shape index: {}]   ;;  %s450_s3 = inlined_call_operand.hbm [shape: f32[16,32], index: 3, kind: input, shape index: {}]   ;;  %s451_s4 = inlined_call_operand.vmem [shape: f32[1,32], index: 4, kind: input, shape index: {}]   ;;  %s452_s5 = inlined_call_operand.hbm [shape: f32[32,32], index: 5, kind: input, shape index: {}]   ;;  %s453_s6 = inlined_call_operand.vmem [shape: f32[1,32], index: 6, kind: input, shape index: {}]   ;;  %s454_s7 = inlined_call_operand.vmem [shape: f32[32,2], index: 7, kind: input, shape index: {}]   ;;  %s455_s8 = inlined_call_operand.vmem [shape: f32[1,2], index: 8, kind: input, shape index: {}]   ;;  %s456_s9 = inlined_call_operand.vmem [shape: f32[8,2], index: 9, kind: output, shape index: {}]  }
   0x1   :  { %15 = vsyncpa [#allocation5], 0  ;;  %s33_s11 = sshll.u32 %s448_s1, 4  ;;  %s34_s11 = int_to_ptr.hbm [resolvable:$true] %s33_s11 }
   0x2   :  { %16 = vsyncpa [#allocation8], 0  ;;  %s340_s12 = smov [#allocation4]   ;;  %s22_s16 = sshll.u32 %s447_s0, 4  ;;  %s23_s16 = int_to_ptr.hbm [resolvable:$true] %s22_s16 }
   0x3   :  { %s35_s13 = sshll.u32 %s340_s12, 4  ;;  %s341_s17 = smov [#allocation2]   ;;  %s36_s13 = int_to_ptr.vmem [resolvable:$true] %s35_s13 }
   0x4   :  { %38 = dma.hbm_to_vmem [thread:$0]  %s34_s11, 128, %s36_s13, [#allocation5]  }
   0x5   :  { %s24_s18 = sshll.u32 %s341_s17, 4  ;;  %s45_s21 = sshll.u32 %s450_s3, 4  ;;  %s25_s18 = int_to_ptr.vmem [resolvable:$true] %s24_s18  ;;  %s46_s21 = int_to_ptr.hbm [resolvable:$true] %s45_s21 }
   0x6   :  { %27 = dma.hbm_to_vmem [thread:$0]  %s23_s16, 128, %s25_s18, [#allocation3]  }
   0x7   :  { %s342_s1 = smov [#allocation6]   ;;  %s60_s25 = sshll.u32 %s452_s5, 4  ;;  %s61_s25 = int_to_ptr.hbm [resolvable:$true] %s60_s25 }
   0x8   :  { %s47_s22 = sshll.u32 %s342_s1, 4  ;;  %s343_s26 = smov 128   ;;  %s48_s22 = int_to_ptr.vmem [resolvable:$true] %s47_s22 }
   0x9   :  { %s344_s0 = smov 8   ;;  %s345_s27 = smov [#allocation7]  }
   0xa   :  { %53 = dma.hbm_to_vmem [thread:$0]  %s46_s21, 256, %s48_s22, [#allocation5], %s343_s26, %s343_s26, %s344_s0  }
   0xb   :  { %s62_s28 = sshll.u32 %s345_s27, 4  ;;  %s63_s28 = int_to_ptr.vmem [resolvable:$true] %s62_s28 }
   0xc   :  { %68 = dma.hbm_to_vmem [thread:$0]  %s61_s25, 512, %s63_s28, [#allocation8], %s343_s26, %s343_s26, %s344_s0  }
   0xd   :  { %334 = dma.done.wait [#allocation3], 128  }
   0xe   :  { %335 = vsyncadd [#allocation3], 4294967168 }
   0xf   :  { %336 = dma.done.wait [#allocation5], 384  }
  0x10   :  { %337 = vsyncadd [#allocation5], 4294966912 }
  0x11   :  { %338 = dma.done.wait [#allocation8], 512  }
  0x12   :  { %339 = vsyncadd [#allocation8], 4294966784  ;;  %v95_v0 = vld [vmem:[%s449_s2 + $0x18] sm:$0xff]  ;;  %v94_v1 = vld [vmem:[%s449_s2 + $0x10] sm:$0xff]  ;;  %vm99_vm0 = vcmask 130048   ;;  %vm123_vm1 = vcmask 261120  }
  0x13   :  { %v98_v2 = vld [vmem:[#allocation6 + $0x8] sm:$0xff]  ;;  %139 = vmatpush.msra.mxu1 %v95_v0  ;;  %v97_v3 = vld [vmem:[#allocation6] sm:$0xff]  ;;  %v93_v4 = vld [vmem:[%s449_s2 + $0x8] sm:$0xff]  ;;  %vm216_vm2 = vcmask 15360  }
  0x14   :  { %117 = vmatpush.msra.mxu0 %v98_v2  ;;  %v96_v5 = vld [vmem:[#allocation4] sm:$0xff]  ;;  %v92_v6 = vld [vmem:[%s449_s2] sm:$0xff]  ;;  %v156_v8 = vld [vmem:[#allocation7 + $0x18] sm:$0xff] }
  0x15   :  { %140 = vmatpush.msra.mxu1 %v94_v1  ;;  %v91_v7 = vld [vmem:[#allocation2] sm:$0xff]  ;;  %176 = vmatpush.msra.mxu2 %v156_v8  ;;  %v155_v9 = vld [vmem:[#allocation7 + $0x10] sm:$0xff]  ;;  %v154_v10 = vld [vmem:[#allocation7 + $0x8] sm:$0xff] }
  0x16   :  { %118 = vmatpush.msra.mxu0 %v97_v3  ;;  %v153_v11 = vld [vmem:[#allocation7] sm:$0xff]  ;;  %v188_v12 = vld [vmem:[%s454_s7 + $0x18] sm:$0xff]  ;;  %v187_v19 = vld [vmem:[%s454_s7 + $0x10] sm:$0xff] }
  0x17   :  { %225 = vmatmul.msk.f32.vlgmr.msra.gmra.mxu0 %vm99_vm0, %v96_v5  ;;  %141 = vmatpush.msra.mxu1 %v93_v4  ;;  %v235_v14 = vld [vmem:[%s451_s4] ss:$0 sm:$0xff]  ;;  %v186_v20 = vld [vmem:[%s454_s7 + $0x8] sm:$0xff] }
  0x18   :  { %177 = vmatpush.msra.mxu2 %v155_v9  ;;  %208 = vmatpush.msra.mxu3 %v188_v12  ;;  %v185_v21 = vld [vmem:[%s454_s7] sm:$0xff] }
  0x19   :  { %142 = vmatpush.msra.mxu1 %v92_v6  ;;  %v236_v22 = vld [vmem:[%s453_s6] ss:$0 sm:$0xff] }
  0x1a   :  { %226 = vmatmul.msk.f32.vlgmr.msra.gmra.mxu1 %vm123_vm1, %v91_v7  ;;  %178 = vmatpush.msra.mxu2 %v154_v10  ;;  %v237_v26 = vld [vmem:[%s455_s8] ss:$0 sm:$0xff] }
  0x1b   :  { %209 = vmatpush.msra.mxu3 %v187_v19 }
  0x1c   :  { %179 = vmatpush.msra.mxu2 %v153_v11 }
  0x1d   :  { %210 = vmatpush.msra.mxu3 %v186_v20 }
  0x1f   :  { %211 = vmatpush.msra.mxu3 %v185_v21 }
  0x94   :  { %v120_v13 = vpop.f32.mrf.mxu0 }
  0x97   :  { %v144_v15 = vpop.f32.mrf.mxu1 }
  0x98   :  { %v145_v16 = vadd.f32 %v144_v15, %v120_v13 }
  0x9a   :  { %v151_v17 = vadd.f32 %v235_v14, %v145_v16 }
  0x9c   :  { %v152_v18 = vmax.f32 %v151_v17, 0.0 }
  0x9e   :  { %227 = vmatmul.msk.f32.vlgmr.msra.gmra.mxu2 %vm123_vm1, %v152_v18 }
 0x121   :  { %v181_v23 = vpop.f32.mrf.mxu2 }
 0x122   :  { %v182_v24 = vadd.f32 %v236_v22, %v181_v23 }
 0x124   :  { %v184_v25 = vmax.f32 %v182_v24, 0.0 }
 0x126   :  { %228 = vmatmul.msk.f32.vlgmr.msra.gmra.mxu3 %vm123_vm1, %v184_v25 }
 0x1a9   :  { %v213_v27 = vpop.f32.mrf.mxu3 }
 0x1aa   :  { %v214_v28 = vadd.f32 %v237_v26, %v213_v27 }
 0x1ac   :  { %217 = vst.msk [vmem:[%s456_s9] sm:$0xff] %vm216_vm2, %v214_v28 }
 0x1ad   :  { %222 = vsyncpa [#allocation3], 1 }
 0x1ae   :  { %223 = vsyncpa [#allocation5], 1 }
 0x1af   :  { %224 = vsyncpa [#allocation8], 1 }

</bundles_post_ra>
